<compile_context>
chip_gen: v7x
topology: tpu7x:2x2x1
jax: 0.10.0
libtpu: 0.0.40
codegen_flags: <defaults>
</compile_context>

<pallas_src>
import functools

import jax
import jax.numpy as jnp
from jax.experimental import pallas as pl
from jax.experimental.pallas import tpu as pltpu


def _round_up(x, m):
    return (x + m - 1) // m * m


def _vmem_capacity_bytes():
    """Physical per-core VMEM; conservative 64 MiB if the query fails."""
    try:
        return int(pltpu.get_tpu_info().vmem_capacity_bytes)
    except Exception:
        return 64 * 1024 * 1024


def _default_tiles(vmem_bytes):
    # 128 MiB VMEM (v5e/v6e): big tiles reach the HBM/MXU roofline.
    # 64 MiB VMEM (v7x per-TC): tm~384 / ti<=512 is compute-bound and fits.
    if vmem_bytes >= 96 * 1024 * 1024:
        return 512, 1024
    return 384, 512


def _pick_ti(I, ti_max):
    """Largest multiple of 128 that divides I and is <= ti_max.
    prepare_llama_mlp_weights pads I so real models always get ti_max."""
    t = min(ti_max, I)
    t = max(128, (t // 128) * 128)
    while t > 128 and I % t != 0:
        t -= 128
    if I % t != 0:
        return I  # tiny / unpadded I only; block == full dim is still legal
    return t


def _llama_mlp_kernel(x_ref, wg_ref, wu_ref, wd_ref, o_ref, acc_ref):
    """One (I-split, M-tile, I-tile) step of the fused MLP.

    x_ref  : (tm, H)   activation tile (resident across the I axis)
    wg_ref : (H, ti)   gate_proj.weight^T block
    wu_ref : (H, ti)   up_proj.weight^T   block
    wd_ref : (ti, H)   down_proj.weight^T block
    o_ref  : (tm, H)   output (partial) tile, written on the last I step
    acc_ref: (tm, H)   f32 VMEM accumulator for the down projection
    """
    j = pl.program_id(2)

    @pl.when(j == 0)
    def _():
        acc_ref[...] = jnp.zeros_like(acc_ref)

    x = x_ref[...]
    # gate / up projections on the MXU, f32 accumulation.
    g = jnp.dot(x, wg_ref[...], preferred_element_type=jnp.float32)
    u = jnp.dot(x, wu_ref[...], preferred_element_type=jnp.float32)
    # SiLU(g) * u in f32 (sigmoid -> EUP; safe on v5e which lacks bf16 VPU/EUP).
    h = (g * jax.nn.sigmoid(g)) * u
    # Partial down projection for this I block, accumulated in f32.
    acc_ref[...] += jnp.dot(h.astype(wd_ref.dtype), wd_ref[...],
                            preferred_element_type=jnp.float32)

    @pl.when(j == pl.num_programs(2) - 1)
    def _():
        o_ref[...] = acc_ref[...].astype(o_ref.dtype)


def prepare_llama_mlp_weights(gate_w, up_w, down_w, dtype=None, i_align=1024):
    """One-time layout fix, done at weight-load time (NOT per forward call):

      * PyTorch [out, in] -> kernel [in, out] transpose.
      * Zero-pad the intermediate dim I up to a multiple of `i_align` so a
        large I tile (512/1024) always divides it exactly.  Padded gate/up
        columns produce g = u = 0 -> silu(0)*0 = 0, and padded down rows are
        zero, so the result is unchanged.
    """
    wg_t = jnp.asarray(gate_w).T        # [H, I]
    wu_t = jnp.asarray(up_w).T          # [H, I]
    wd_t = jnp.asarray(down_w).T        # [I, H]
    I = wg_t.shape[1]
    I_pad = _round_up(I, max(128, int(i_align)))
    if I_pad != I:
        wg_t = jnp.pad(wg_t, ((0, 0), (0, I_pad - I)))
        wu_t = jnp.pad(wu_t, ((0, 0), (0, I_pad - I)))
        wd_t = jnp.pad(wd_t, ((0, I_pad - I), (0, 0)))
    if dtype is not None:
        wg_t = wg_t.astype(dtype)
        wu_t = wu_t.astype(dtype)
        wd_t = wd_t.astype(dtype)
    return wg_t, wu_t, wd_t


@functools.partial(jax.jit, static_argnames=("tm", "ti", "i_splits"))
def llama_mlp(x, wg_t, wu_t, wd_t, *, tm=None, ti=None, i_splits=1):
    """Fused LlamaMLP forward.

    x        : [..., H] activations (any leading batch/seq dims)
    wg_t     : [H, I]  gate_proj.weight^T  (from prepare_llama_mlp_weights)
    wu_t     : [H, I]  up_proj.weight^T
    wd_t     : [I, H]  down_proj.weight^T
    tm, ti   : token / intermediate tiles; None -> per-generation defaults
               (tm=512, ti=1024 on 128 MiB VMEM chips; tm=384, ti=512 on v7x)
    i_splits : split the I axis into this many "parallel" partials (set to 2
               on v7x decode so both TensorCores stream half the weights).
    """
    orig_shape = x.shape
    H = x.shape[-1]
    I = wg_t.shape[1]
    M = 1
    for d in x.shape[:-1]:
        M *= d

    vmem_cap = _vmem_capacity_bytes()
    tm_def, ti_def = _default_tiles(vmem_cap)
    if tm is None:
        tm = tm_def
    if ti is None:
        ti = ti_def

    itemsize = jnp.dtype(x.dtype).itemsize
    pack = max(8, 32 // itemsize)        # sublane packing: 8 f32 / 16 bf16 / 32 int8

    tm_eff = min(_round_up(tm, pack), _round_up(M, pack))
    M_pad = _round_up(M, tm_eff)
    ti_eff = _pick_ti(I, ti)

    n_m = M_pad // tm_eff
    n_i_total = I // ti_eff
    n_split = i_splits if (i_splits > 1 and n_i_total % i_splits == 0) else 1
    n_i = n_i_total // n_split

    x2d = x.reshape(M, H)
    if M_pad != M:
        x2d = jnp.pad(x2d, ((0, M_pad - M), (0, 0)))

    grid = (n_split, n_m, n_i)

    # Honest VMEM budget: double-buffered pipelined blocks, f32 accumulator,
    # f32 intermediates (g, u, h), plus internal-scratch margin.
    tile_bytes = (
        2 * tm_eff * H * itemsize                       # x (double-buffered)
        + 2 * (2 * H * ti_eff + ti_eff * H) * itemsize  # wg, wu, wd blocks
        + 2 * tm_eff * H * itemsize                     # output blocks
        + tm_eff * H * 4                                # f32 accumulator
        + 3 * tm_eff * ti_eff * 4                       # f32 g, u, h
        + 2 * 1024 * 1024                               # Mosaic internal scratch
    )
    vmem_limit = int(min(vmem_cap - 4 * 1024 * 1024,
                         max(32 * 1024 * 1024, (tile_bytes * 5) // 4)))

    cost = pl.CostEstimate(
        flops=6 * M_pad * H * I,                        # gate + up + down matmuls
        transcendentals=M_pad * I,                      # sigmoid
        # weights are re-streamed once per M tile
        bytes_accessed=(2 * M_pad * H + n_m * 3 * H * I) * itemsize,
    )

    def x_map(s, i, j):
        return (i, 0)

    def w_in_map(s, i, j):            # gate / up blocks: [H, ti]
        return (0, s * n_i + j)

    def w_down_map(s, i, j):          # down blocks: [ti, H]
        return (s * n_i + j, 0)

    def out_map(s, i, j):
        return (s, i, 0)

    out3d = pl.pallas_call(
        _llama_mlp_kernel,
        out_shape=jax.ShapeDtypeStruct((n_split, M_pad, H), x.dtype),
        grid_spec=pltpu.PrefetchScalarGridSpec(
            num_scalar_prefetch=0,
            grid=grid,
            in_specs=[
                pl.BlockSpec((tm_eff, H), x_map),        # x tile
                pl.BlockSpec((H, ti_eff), w_in_map),     # gate_w^T block
                pl.BlockSpec((H, ti_eff), w_in_map),     # up_w^T   block
                pl.BlockSpec((ti_eff, H), w_down_map),   # down_w^T block
            ],
            out_specs=pl.BlockSpec((pl.Squeezed(), tm_eff, H), out_map),
            scratch_shapes=[pltpu.VMEM((tm_eff, H), jnp.float32)],
        ),
        compiler_params=pltpu.CompilerParams(
            dimension_semantics=("parallel", "parallel", "arbitrary"),
            vmem_limit_bytes=vmem_limit,
        ),
        cost_estimate=cost,
    )(x2d, wg_t, wu_t, wd_t)

    if n_split == 1:
        out2d = out3d[0]
    else:
        out2d = jnp.sum(out3d, axis=0, dtype=out3d.dtype)
    if M_pad != M:
        out2d = out2d[:M]
    return out2d.reshape(orig_shape)


def llama_mlp_ref(x, gate_w, up_w, down_w):
    """Pure-JAX reference (matches the PyTorch forward, pretraining_tp == 1)."""
    g = x @ gate_w.T
    u = x @ up_w.T
    return (jax.nn.silu(g) * u) @ down_w.T


if __name__ == "__main__":
    key = jax.random.PRNGKey(0)

    # ---- Test 1: small config consistent with the module (f32, defaults) --
    B, S, H, I = 2, 8, 32, 64
    kx, kg, ku, kd, key = jax.random.split(key, 5)
    x = jax.random.normal(kx, (B, S, H), dtype=jnp.float32)
    gate_w = jax.random.normal(kg, (I, H), dtype=jnp.float32) * 0.05
    up_w = jax.random.normal(ku, (I, H), dtype=jnp.float32) * 0.05
    down_w = jax.random.normal(kd, (H, I), dtype=jnp.float32) * 0.05

    wg_t, wu_t, wd_t = prepare_llama_mlp_weights(gate_w, up_w, down_w)
    out = jax.block_until_ready(llama_mlp(x, wg_t, wu_t, wd_t))
    ref = llama_mlp_ref(x, gate_w, up_w, down_w)
    assert out.shape == (B, S, H)
    assert jnp.allclose(out, ref, atol=1e-5, rtol=1e-5), "f32 mismatch vs reference"

    # ---- Test 2: ragged M + multi-M-tile grid + multi-step I accumulation -
    B2, S2, H2, I2 = 2, 20, 256, 512          # M=40 -> padded with tm=16
    kx, kg, ku, kd, key = jax.random.split(key, 5)
    x2 = jax.random.normal(kx, (B2, S2, H2), dtype=jnp.float32)
    gate_w2 = jax.random.normal(kg, (I2, H2), dtype=jnp.float32) * 0.05
    up_w2 = jax.random.normal(ku, (I2, H2), dtype=jnp.float32) * 0.05
    down_w2 = jax.random.normal(kd, (H2, I2), dtype=jnp.float32) * 0.05

    wg2, wu2, wd2 = prepare_llama_mlp_weights(gate_w2, up_w2, down_w2)  # I -> 1024
    out2 = jax.block_until_ready(llama_mlp(x2, wg2, wu2, wd2, tm=16, ti=256))
    ref2 = llama_mlp_ref(x2, gate_w2, up_w2, down_w2)
    assert out2.shape == (B2, S2, H2)
    assert jnp.allclose(out2, ref2, atol=1e-4, rtol=1e-4), "tiled f32 mismatch"

    # ---- Test 3: bf16 weights/activations (production dtype path) ---------
    x_bf = x2.astype(jnp.bfloat16)
    wg_bf, wu_bf, wd_bf = prepare_llama_mlp_weights(
        gate_w2, up_w2, down_w2, dtype=jnp.bfloat16)
    out_bf = jax.block_until_ready(
        llama_mlp(x_bf, wg_bf, wu_bf, wd_bf, tm=16, ti=256))
    ref_bf = llama_mlp_ref(x_bf.astype(jnp.float32),
                           gate_w2.astype(jnp.bfloat16).astype(jnp.float32),
                           up_w2.astype(jnp.bfloat16).astype(jnp.float32),
                           down_w2.astype(jnp.bfloat16).astype(jnp.float32))
    assert out_bf.shape == (B2, S2, H2)
    assert bool(jnp.all(jnp.isfinite(out_bf.astype(jnp.float32))))
    assert jnp.allclose(out_bf.astype(jnp.float32), ref_bf,
                        atol=2e-2, rtol=5e-2), "bf16 mismatch vs reference"

    # ---- Test 4: I-axis split (v7x decode path) correctness ----------------
    out4 = jax.block_until_ready(
        llama_mlp(x2, wg2, wu2, wd2, tm=16, ti=256, i_splits=2))
    assert out4.shape == (B2, S2, H2)
    assert jnp.allclose(out4, ref2, atol=1e-4, rtol=1e-4), "i_splits=2 mismatch"

    print("KERNEL_OK")
</pallas_src>

<mosaic_0001>
module attributes {stable_mosaic.version = 11 : i64} {
  func.func @_llama_mlp_kernel(%arg0: i32, %arg1: i32, %arg2: i32, %arg3: memref<16x32xf32, #tpu.memory_space<vmem>>, %arg4: memref<32x512xf32, #tpu.memory_space<vmem>>, %arg5: memref<32x512xf32, #tpu.memory_space<vmem>>, %arg6: memref<512x32xf32, #tpu.memory_space<vmem>>, %arg7: memref<1x16x32xf32, #tpu.memory_space<vmem>>, %arg8: memref<16x32xf32, #tpu.memory_space<vmem>>) attributes {dimension_semantics = [#tpu.dimension_semantics<parallel>, #tpu.dimension_semantics<parallel>, #tpu.dimension_semantics<arbitrary>], iteration_bounds = array<i64: 1, 1, 2>, scalar_prefetch = 0 : i64, scratch_operands = 1 : i64, tpu.core_type = #tpu.core_type<tc>, window_params = [{transform_indices = @transform_0, window_bounds = array<i64: 16, 32>}, {transform_indices = @transform_1, window_bounds = array<i64: 32, 512>}, {transform_indices = @transform_2, window_bounds = array<i64: 32, 512>}, {transform_indices = @transform_3, window_bounds = array<i64: 512, 32>}, {transform_indices = @transform_4, window_bounds = array<i64: 1, 16, 32>}]} {
    %c0_i32 = arith.constant 0 : i32
    %0 = arith.cmpi eq, %arg2, %c0_i32 : i32
    %1 = arith.extui %0 : i1 to i32
    %c0_i32_0 = arith.constant 0 : i32
    %2 = arith.cmpi ne, %1, %c0_i32_0 : i32
    scf.if %2 {
      %cst_16 = arith.constant 0.000000e+00 : f32
      %23 = vector.broadcast %cst_16 : f32 to vector<16x32xf32>
      %c0_17 = arith.constant 0 : index
      %c0_18 = arith.constant 0 : index
      %24 = vector.load %arg8[%c0_17, %c0_18] : memref<16x32xf32, #tpu.memory_space<vmem>>, vector<16x32xf32>
      tpu.vector_store %arg8[%c0_17, %c0_18], %23 {strides = array<i32>} : memref<16x32xf32, #tpu.memory_space<vmem>>, vector<16x32xf32>,
    } else {
    }
    %c0 = arith.constant 0 : index
    %c0_1 = arith.constant 0 : index
    %3 = vector.load %arg3[%c0, %c0_1] : memref<16x32xf32, #tpu.memory_space<vmem>>, vector<16x32xf32>
    %c0_2 = arith.constant 0 : index
    %c0_3 = arith.constant 0 : index
    %4 = vector.load %arg4[%c0_2, %c0_3] : memref<32x512xf32, #tpu.memory_space<vmem>>, vector<32x512xf32>
    %cst = arith.constant dense<0.000000e+00> : vector<16x512xf32>
    %5 = tpu.matmul %3, %4, %cst {dimension_numbers = #tpu.dot_dimension_numbers<[1], [0], [0], [1], [0, 0, 1, 1], [], []>} : vector<16x32xf32>, vector<32x512xf32>, vector<16x512xf32> -> vector<16x512xf32>
    %c0_4 = arith.constant 0 : index
    %c0_5 = arith.constant 0 : index
    %6 = vector.load %arg5[%c0_4, %c0_5] : memref<32x512xf32, #tpu.memory_space<vmem>>, vector<32x512xf32>
    %cst_6 = arith.constant dense<0.000000e+00> : vector<16x512xf32>
    %7 = tpu.matmul %3, %6, %cst_6 {dimension_numbers = #tpu.dot_dimension_numbers<[1], [0], [0], [1], [0, 0, 1, 1], [], []>} : vector<16x32xf32>, vector<32x512xf32>, vector<16x512xf32> -> vector<16x512xf32>
    %8 = arith.negf %5 : vector<16x512xf32>
    %9 = math.exp %8 : vector<16x512xf32>
    %cst_7 = arith.constant 1.000000e+00 : f32
    %10 = vector.broadcast %cst_7 : f32 to vector<16x512xf32>
    %11 = arith.addf %10, %9 : vector<16x512xf32>
    %12 = arith.divf %10, %11 : vector<16x512xf32>
    %13 = arith.mulf %5, %12 : vector<16x512xf32>
    %14 = arith.mulf %13, %7 : vector<16x512xf32>
    %c0_8 = arith.constant 0 : index
    %c0_9 = arith.constant 0 : index
    %15 = vector.load %arg8[%c0_8, %c0_9] : memref<16x32xf32, #tpu.memory_space<vmem>>, vector<16x32xf32>
    %c0_10 = arith.constant 0 : index
    %c0_11 = arith.constant 0 : index
    %16 = vector.load %arg6[%c0_10, %c0_11] : memref<512x32xf32, #tpu.memory_space<vmem>>, vector<512x32xf32>
    %cst_12 = arith.constant dense<0.000000e+00> : vector<16x32xf32>
    %17 = tpu.matmul %14, %16, %cst_12 {dimension_numbers = #tpu.dot_dimension_numbers<[1], [0], [0], [1], [0, 0, 1, 1], [], []>} : vector<16x512xf32>, vector<512x32xf32>, vector<16x32xf32> -> vector<16x32xf32>
    %18 = arith.addf %15, %17 : vector<16x32xf32>
    %c0_13 = arith.constant 0 : index
    %c0_14 = arith.constant 0 : index
    %19 = vector.load %arg8[%c0_13, %c0_14] : memref<16x32xf32, #tpu.memory_space<vmem>>, vector<16x32xf32>
    tpu.vector_store %arg8[%c0_13, %c0_14], %18 {strides = array<i32>} : memref<16x32xf32, #tpu.memory_space<vmem>>, vector<16x32xf32>,
    %c1_i32 = arith.constant 1 : i32
    %20 = arith.cmpi eq, %arg2, %c1_i32 : i32
    %21 = arith.extui %20 : i1 to i32
    %c0_i32_15 = arith.constant 0 : i32
    %22 = arith.cmpi ne, %21, %c0_i32_15 : i32
    scf.if %22 {
      %c0_16 = arith.constant 0 : index
      %c0_17 = arith.constant 0 : index
      %23 = vector.load %arg8[%c0_16, %c0_17] : memref<16x32xf32, #tpu.memory_space<vmem>>, vector<16x32xf32>
      %c0_18 = arith.constant 0 : index
      %c0_19 = arith.constant 0 : index
      %c0_20 = arith.constant 0 : index
      %24 = vector.load %arg7[%c0_18, %c0_19, %c0_20] : memref<1x16x32xf32, #tpu.memory_space<vmem>>, vector<1x16x32xf32>
      %25 = vector.shape_cast %24 : vector<1x16x32xf32> to vector<16x32xf32>
      %26 = vector.shape_cast %23 : vector<16x32xf32> to vector<1x16x32xf32>
      tpu.vector_store %arg7[%c0_18, %c0_19, %c0_20], %26 {strides = array<i32>} : memref<1x16x32xf32, #tpu.memory_space<vmem>>, vector<1x16x32xf32>,
    } else {
    }
    return
  }
  func.func @transform_0(%arg0: i32, %arg1: i32, %arg2: i32) -> (i32, i32) {
    %c0_i32 = arith.constant 0 : i32
    %c0_i32_0 = arith.constant 0 : i32
    return %arg1, %c0_i32 : i32, i32
  }
  func.func @transform_1(%arg0: i32, %arg1: i32, %arg2: i32) -> (i32, i32) {
    %c2_i32 = arith.constant 2 : i32
    %0 = arith.muli %arg0, %c2_i32 : i32
    %1 = arith.addi %0, %arg2 : i32
    %c0_i32 = arith.constant 0 : i32
    %c0_i32_0 = arith.constant 0 : i32
    return %c0_i32, %1 : i32, i32
  }
  func.func @transform_2(%arg0: i32, %arg1: i32, %arg2: i32) -> (i32, i32) {
    %c2_i32 = arith.constant 2 : i32
    %0 = arith.muli %arg0, %c2_i32 : i32
    %1 = arith.addi %0, %arg2 : i32
    %c0_i32 = arith.constant 0 : i32
    %c0_i32_0 = arith.constant 0 : i32
    return %c0_i32, %1 : i32, i32
  }
  func.func @transform_3(%arg0: i32, %arg1: i32, %arg2: i32) -> (i32, i32) {
    %c2_i32 = arith.constant 2 : i32
    %0 = arith.muli %arg0, %c2_i32 : i32
    %1 = arith.addi %0, %arg2 : i32
    %c0_i32 = arith.constant 0 : i32
    %c0_i32_0 = arith.constant 0 : i32
    return %1, %c0_i32 : i32, i32
  }
  func.func @transform_4(%arg0: i32, %arg1: i32, %arg2: i32) -> (i32, i32, i32) {
    %c0_i32 = arith.constant 0 : i32
    %c0_i32_0 = arith.constant 0 : i32
    return %arg0, %arg1, %c0_i32 : i32, i32, i32
  }
}

</mosaic_0001>

<bundles_post_ra>
// kernel: llama_mlp.1
= control target key start
LH: loop header
LB: loop body
LE: loop exit
PB: predicated region body
PF: predicated region fallthrough
CT: control target
= control target key end

     0   :  { %9 = vsyncpa [#allocation6], 0  ;;  %s1574_s15 = smov 0   ;;  %s1576_s16 = smov 0   ;;  %s1847_s0 = inlined_call_operand.vmem [shape: f32[16,32], index: 0, kind: input, shape index: {}]   ;;  %s1848_s1 = inlined_call_operand.vmem [shape: f32[32,1024], index: 1, kind: input, shape index: {}]   ;;  %s1849_s2 = inlined_call_operand.vmem [shape: f32[32,1024], index: 2, kind: input, shape index: {}]   ;;  %s1850_s3 = inlined_call_operand.vmem [shape: f32[1024,32], index: 3, kind: input, shape index: {}]   ;;  %s1851_s4 = inlined_call_operand.hbm [shape: f32[1,16,32], index: 4, kind: output, shape index: {}]  }
   0x1   :  { %s1578_s17 = smov 0   ;;  %s1580_s18 = smov 0  }
   0x2   :  { %s1582_s19 = smov 0  }
   0x3 LB: > { %s1180_s20 = sadd.s32 4294967295, %s1542_s19   ;;  %s27_s21 = sadd.s32 1, %s1538_s18  ;;  %s1542_s19 = sphi %s1582_s19, %s15_s19   ;;  %s1538_s18 = sphi %s1580_s18, %s1857_s18   ;;  %s1534_s17 = sphi %s1578_s17, %s1856_s17   ;;  %s1530_s16 = sphi %s1576_s16, %s1855_s16   ;;  %s1526_s15 = sphi %s1574_s15, %s1854_s15  }
   0x4   : > { %p28_p0 = scmp.ge.s32.totalorder %s27_s21, 2  ;;  %p78_p1 = scmp.ne.s32.totalorder %s1530_s16, %s1526_s15 }
   0x5   : > { %p79_p2 = scmp.eq.s32.totalorder %s1542_s19, 0  ;;  %s71_s24 = sadd.s32 1, %s1530_s16 }
   0x6   : > { %s1859_s21 = smov (%p28_p0, %s27_s21), 0  ;;  %p1183_p5 = scmp.ge.s32.totalorder %s1542_s19, 2 }
   0x7   : > { %p1606_p3 = por %p79_p2, %p78_p1  ;;  %s68_s23 = ssub.s32 %s1538_s18, %s1859_s21 }
   0x8   : > { %p69_p4 = scmp.eq.s32.totalorder %s68_s23, 0  ;;  %201 = sbr.rel (%p1183_p5) target bundleno = 39 (0x27), region = 20 }
   0xa   : > { %s1614_s25 = scalar_select %p69_p4, %s1530_s16, %s71_s24  }
   0xf   : > { %204 = sbr.rel (!%p1606_p3) target bundleno = 27 (0x1b), region = 24  ;;  %s206_s26 = sand.u32 (%p1606_p3), 1, %s1530_s16  }
  0x10   : > { %s1217_s27 = sshll.u32 (%p1606_p3), %s1538_s18, 5  ;;  %s1184_s28 = sshll.u32 (%p1606_p3), %s206_s26, 7 }
  0x11   : > { %s1624_s5 = scalar_lea.vmem (%p1606_p3), %s1848_s1, %s1217_s27  ;;  %s208_s6 = scalar_lea.vmem (%p1606_p3), [#allocation3], %s1184_s28 }
  0x12   : > { %v226_v0 = vld [vmem:[%s1624_s5] sm:$0xff] (%p1606_p3)  ;;  %v228_v1 = vld [vmem:[%s1624_s5 + $0x8] sm:$0xff] (%p1606_p3)  ;;  %v230_v2 = vld [vmem:[%s1624_s5 + $0x10] sm:$0xff] (%p1606_p3) }
  0x13   : > { %227 = vst [vmem:[%s208_s6] sm:$0xff] (%p1606_p3), %v226_v0  ;;  %229 = vst [vmem:[%s208_s6 + $0x8] sm:$0xff] (%p1606_p3), %v228_v1  ;;  %v232_v3 = vld [vmem:[%s1624_s5 + $0x18] sm:$0xff] (%p1606_p3)  ;;  %v234_v4 = vld [vmem:[%s1624_s5 + $0x40] sm:$0xff] (%p1606_p3) }
  0x14   : > { %231 = vst [vmem:[%s208_s6 + $0x10] sm:$0xff] (%p1606_p3), %v230_v2  ;;  %v236_v5 = vld [vmem:[%s1624_s5 + $0x48] sm:$0xff] (%p1606_p3)  ;;  %233 = vst [vmem:[%s208_s6 + $0x18] sm:$0xff] (%p1606_p3), %v232_v3  ;;  %v238_v6 = vld [vmem:[%s1624_s5 + $0x50] sm:$0xff] (%p1606_p3) }
  0x15   : > { %235 = vst [vmem:[%s208_s6 + $0x20] sm:$0xff] (%p1606_p3), %v234_v4  ;;  %237 = vst [vmem:[%s208_s6 + $0x28] sm:$0xff] (%p1606_p3), %v236_v5  ;;  %v240_v7 = vld [vmem:[%s1624_s5 + $0x58] sm:$0xff] (%p1606_p3)  ;;  %v242_v8 = vld [vmem:[%s1624_s5 + $0x80] sm:$0xff] (%p1606_p3) }
  0x16   : > { %239 = vst [vmem:[%s208_s6 + $0x30] sm:$0xff] %v238_v6  ;;  %241 = vst [vmem:[%s208_s6 + $0x38] sm:$0xff] %v240_v7  ;;  %v244_v9 = vld [vmem:[%s1624_s5 + $0x88] sm:$0xff]  ;;  %v246_v10 = vld [vmem:[%s1624_s5 + $0x90] sm:$0xff] }
  0x17   : > { %243 = vst [vmem:[%s208_s6 + $0x40] sm:$0xff] %v242_v8  ;;  %v248_v11 = vld [vmem:[%s1624_s5 + $0x98] sm:$0xff]  ;;  %245 = vst [vmem:[%s208_s6 + $0x48] sm:$0xff] %v244_v9  ;;  %v250_v12 = vld [vmem:[%s1624_s5 + $0xc0] sm:$0xff] }
  0x18   : > { %247 = vst [vmem:[%s208_s6 + $0x50] sm:$0xff] %v246_v10  ;;  %249 = vst [vmem:[%s208_s6 + $0x58] sm:$0xff] %v248_v11  ;;  %v252_v13 = vld [vmem:[%s1624_s5 + $0xc8] sm:$0xff]  ;;  %v254_v14 = vld [vmem:[%s1624_s5 + $0xd0] sm:$0xff] }
  0x19   : > { %251 = vst [vmem:[%s208_s6 + $0x60] sm:$0xff] %v250_v12  ;;  %253 = vst [vmem:[%s208_s6 + $0x68] sm:$0xff] %v252_v13  ;;  %v256_v15 = vld [vmem:[%s1624_s5 + $0xd8] sm:$0xff] }
  0x1a   : > { %255 = vst [vmem:[%s208_s6 + $0x70] sm:$0xff] %v254_v14  ;;  %257 = vst [vmem:[%s208_s6 + $0x78] sm:$0xff] %v256_v15 }
  0x1b PF: > { %263 = sbr.rel (!%p1606_p3) target bundleno = 39 (0x27), region = 47  ;;  %s265_s7 = sand.u32 (%p1606_p3), 1, %s1530_s16  }
  0x1c   : > { %s1218_s8 = sshll.u32 (%p1606_p3), %s1538_s18, 5  ;;  %s1187_s9 = sshll.u32 (%p1606_p3), %s265_s7, 7 }
  0x1d   : > { %s1649_s12 = scalar_lea.vmem (%p1606_p3), %s1849_s2, %s1218_s8  ;;  %s267_s13 = scalar_lea.vmem (%p1606_p3), [#allocation4], %s1187_s9 }
  0x1e   : > { %v285_v16 = vld [vmem:[%s1649_s12] sm:$0xff] (%p1606_p3)  ;;  %v287_v17 = vld [vmem:[%s1649_s12 + $0x8] sm:$0xff] (%p1606_p3)  ;;  %v289_v18 = vld [vmem:[%s1649_s12 + $0x10] sm:$0xff] (%p1606_p3) }
  0x1f   : > { %286 = vst [vmem:[%s267_s13] sm:$0xff] (%p1606_p3), %v285_v16  ;;  %288 = vst [vmem:[%s267_s13 + $0x8] sm:$0xff] (%p1606_p3), %v287_v17  ;;  %v291_v19 = vld [vmem:[%s1649_s12 + $0x18] sm:$0xff] (%p1606_p3)  ;;  %v293_v20 = vld [vmem:[%s1649_s12 + $0x40] sm:$0xff] (%p1606_p3) }
  0x20   : > { %290 = vst [vmem:[%s267_s13 + $0x10] sm:$0xff] (%p1606_p3), %v289_v18  ;;  %v295_v21 = vld [vmem:[%s1649_s12 + $0x48] sm:$0xff] (%p1606_p3)  ;;  %292 = vst [vmem:[%s267_s13 + $0x18] sm:$0xff] (%p1606_p3), %v291_v19  ;;  %v297_v22 = vld [vmem:[%s1649_s12 + $0x50] sm:$0xff] (%p1606_p3) }
  0x21   : > { %294 = vst [vmem:[%s267_s13 + $0x20] sm:$0xff] (%p1606_p3), %v293_v20  ;;  %296 = vst [vmem:[%s267_s13 + $0x28] sm:$0xff] (%p1606_p3), %v295_v21  ;;  %v299_v23 = vld [vmem:[%s1649_s12 + $0x58] sm:$0xff] (%p1606_p3)  ;;  %v301_v24 = vld [vmem:[%s1649_s12 + $0x80] sm:$0xff] (%p1606_p3) }
  0x22   : > { %298 = vst [vmem:[%s267_s13 + $0x30] sm:$0xff] %v297_v22  ;;  %300 = vst [vmem:[%s267_s13 + $0x38] sm:$0xff] %v299_v23  ;;  %v303_v25 = vld [vmem:[%s1649_s12 + $0x88] sm:$0xff]  ;;  %v305_v26 = vld [vmem:[%s1649_s12 + $0x90] sm:$0xff] }
  0x23   : > { %302 = vst [vmem:[%s267_s13 + $0x40] sm:$0xff] %v301_v24  ;;  %v307_v27 = vld [vmem:[%s1649_s12 + $0x98] sm:$0xff]  ;;  %304 = vst [vmem:[%s267_s13 + $0x48] sm:$0xff] %v303_v25  ;;  %v309_v28 = vld [vmem:[%s1649_s12 + $0xc0] sm:$0xff] }
  0x24   : > { %306 = vst [vmem:[%s267_s13 + $0x50] sm:$0xff] %v305_v26  ;;  %308 = vst [vmem:[%s267_s13 + $0x58] sm:$0xff] %v307_v27  ;;  %v311_v29 = vld [vmem:[%s1649_s12 + $0xc8] sm:$0xff]  ;;  %v313_v30 = vld [vmem:[%s1649_s12 + $0xd0] sm:$0xff] }
  0x25   : > { %310 = vst [vmem:[%s267_s13 + $0x60] sm:$0xff] %v309_v28  ;;  %312 = vst [vmem:[%s267_s13 + $0x68] sm:$0xff] %v311_v29  ;;  %v315_v31 = vld [vmem:[%s1649_s12 + $0xd8] sm:$0xff] }
  0x26   : > { %314 = vst [vmem:[%s267_s13 + $0x70] sm:$0xff] %v313_v30  ;;  %316 = vst [vmem:[%s267_s13 + $0x78] sm:$0xff] %v315_v31 }
  0x27 PF: > { %p1190_p6 = scmp.ge.s32.totalorder %s1542_s19, 1  ;;  %p334_p7 = scmp.lt.s32.totalorder %s1542_s19, 3 }
  0x29   : > { %p335_p8 = pnand %p1190_p6, %p334_p7 }
  0x2a   : > { %s341_s14 = sand.u32 (!%p335_p8), 1, %s1526_s15   ;;  %s1193_s22 = sshll.u32 (!%p335_p8), %s1534_s17, 6 }
  0x2b   : > { %338 = sbr.rel (%p335_p8) target bundleno = 573 (0x23d), region = 74  ;;  %s1191_s23 = sshll.u32 (!%p335_p8), %s341_s14, 7 }
  0x2c   : > { %p399_p9 = scmp.lt.s32.totalorder (!%p335_p8), %s1193_s22, 127  ;;  %s1676_s29 = scalar_lea.vmem (!%p335_p8), [#allocation3], %s1191_s23 }
  0x2d   : > { %s1678_s30 = scalar_lea.vmem (!%p335_p8), [#allocation4], %s1191_s23  ;;  %p1195_p10 = scmp.ne.s32.totalorder (!%p335_p8), %s1534_s17, 0 }
  0x32   : > { %s1861_s22 = smov (!%p399_p9, %s1193_s22), 127  ;;  %410 = sbr.rel (%p1195_p10) target bundleno = 57 (0x39), region = 86 }
  0x33   : > { %s1194_s24 = sshll.u32 %s1861_s22, 3  ;;  %vm411_vm0 = vcmask (!%p1195_p10), 261120   ;;  %v1544_v32 = vmov (!%p1195_p10), 0.0  }
  0x34   : > { %s1674_s28 = scalar_lea.vmem %s1850_s3, %s1194_s24  ;;  %412 = vst.msk [vmem:[#allocation2] sm:$0xff] (!%p1195_p10), %vm411_vm0, %v1544_v32  ;;  %413 = vst.msk [vmem:[#allocation2 + $0x8] sm:$0xff] (!%p1195_p10), %vm411_vm0, %v1544_v32 }
  0x39 PF: > { %v417_v33 = vld [vmem:[%s1676_s29 + $0x8] sm:$0xff]  ;;  %v419_v35 = vld [vmem:[%s1676_s29 + $0x18] sm:$0xff]  ;;  %v416_v38 = vld [vmem:[%s1676_s29] sm:$0xff]  ;;  %v1545_v40 = vmov 0.0   ;;  %vm432_vm1 = vcmask 261120   ;;  %p1212_p11 = scmp.ne.s32.totalorder %s1534_s17, 1 }
  0x3a   : > { %v421_v34 = vld [vmem:[%s1676_s29 + $0x28] sm:$0xff]  ;;  %v423_v37 = vld [vmem:[%s1676_s29 + $0x38] sm:$0xff]  ;;  %v420_v39 = vld [vmem:[%s1676_s29 + $0x20] sm:$0xff]  ;;  %503 = vmatprep.mubr.f32.mxu0 %v1545_v40  ;;  %580 = vmatprep.mubr.f32.mxu1 %v1545_v40 }
  0x3b   : > { %v1295_v36 = vpack.c.bf16 %v421_v34, %v417_v33  ;;  %v1303_v41 = vpack.c.bf16 %v423_v37, %v419_v35  ;;  %v1297_v42 = vpack.c.bf16 %v420_v39, %v416_v38  ;;  %v418_v43 = vld [vmem:[%s1676_s29 + $0x10] sm:$0xff]  ;;  %v425_v45 = vld [vmem:[%s1676_s29 + $0x48] sm:$0xff]  ;;  %v427_v48 = vld [vmem:[%s1676_s29 + $0x58] sm:$0xff] }
  0x3c   : > { %v422_v44 = vld [vmem:[%s1676_s29 + $0x30] sm:$0xff]  ;;  %v429_v47 = vld [vmem:[%s1676_s29 + $0x68] sm:$0xff]  ;;  %v431_v49 = vld [vmem:[%s1676_s29 + $0x78] sm:$0xff] }
  0x3d   : > { %1296 = vmatprep.subr.bf16.mxu0 %v1295_v36  ;;  %v1305_v46 = vpack.c.bf16 %v422_v44, %v418_v43  ;;  %1304 = vmatprep.subr.bf16.mxu1 %v1303_v41  ;;  %v1299_v50 = vpack.c.bf16 %v429_v47, %v425_v45  ;;  %v1307_v51 = vpack.c.bf16 %v431_v49, %v427_v48  ;;  %v424_v52 = vld [vmem:[%s1676_s29 + $0x40] sm:$0xff]  ;;  %v426_v54 = vld [vmem:[%s1676_s29 + $0x50] sm:$0xff]  ;;  %v594_v59 = vld [vmem:[%s1678_s30 + $0x8] sm:$0xff] }
  0x3e   : > { %1298 = vmatpush1.bf16.msra.mxu0 %v1297_v42  ;;  %v428_v53 = vld [vmem:[%s1676_s29 + $0x60] sm:$0xff]  ;;  %v430_v56 = vld [vmem:[%s1676_s29 + $0x70] sm:$0xff]  ;;  %v598_v60 = vld [vmem:[%s1678_s30 + $0x28] sm:$0xff] }
  0x3f   : > { %1306 = vmatpush1.bf16.msra.mxu1 %v1305_v46  ;;  %v1301_v55 = vpack.c.bf16 %v428_v53, %v424_v52  ;;  %1300 = vmatprep.subr.bf16.mxu0 %v1299_v50  ;;  %v1309_v57 = vpack.c.bf16 %v430_v56, %v426_v54  ;;  %v414_v58 = vld [vmem:[%s1847_s0] sm:$0xff]  ;;  %v596_v61 = vld [vmem:[%s1678_s30 + $0x18] sm:$0xff]  ;;  %v1311_v62 = vpack.c.bf16 %v598_v60, %v594_v59  ;;  %v593_v0 = vld [vmem:[%s1678_s30] sm:$0xff] }
  0x40   : > { %1308 = vmatprep.subr.bf16.mxu1 %v1307_v51  ;;  %v600_v63 = vld [vmem:[%s1678_s30 + $0x38] sm:$0xff]  ;;  %v597_v1 = vld [vmem:[%s1678_s30 + $0x20] sm:$0xff]  ;;  %v595_v3 = vld [vmem:[%s1678_s30 + $0x10] sm:$0xff] }
  0x41   : > { %v1319_v2 = vpack.c.bf16 %v600_v63, %v596_v61  ;;  %v599_v4 = vld [vmem:[%s1678_s30 + $0x30] sm:$0xff]  ;;  %v602_v5 = vld [vmem:[%s1678_s30 + $0x48] sm:$0xff]  ;;  %v1313_v6 = vpack.c.bf16 %v597_v1, %v593_v0  ;;  %v604_v8 = vld [vmem:[%s1678_s30 + $0x58] sm:$0xff] }
  0x42   : > { %1302 = vmatpush1.bf16.msra.mxu0 %v1301_v55  ;;  %v606_v7 = vld [vmem:[%s1678_s30 + $0x68] sm:$0xff]  ;;  %v608_v9 = vld [vmem:[%s1678_s30 + $0x78] sm:$0xff]  ;;  %v1321_v10 = vpack.c.bf16 %v599_v4, %v595_v3  ;;  %v601_v12 = vld [vmem:[%s1678_s30 + $0x40] sm:$0xff] }
  0x43   : > { %1310 = vmatpush1.bf16.msra.mxu1 %v1309_v57  ;;  %1312 = vmatprep.subr.bf16.mxu0 %v1311_v62  ;;  %v1315_v11 = vpack.c.bf16 %v606_v7, %v602_v5  ;;  %v605_v13 = vld [vmem:[%s1678_s30 + $0x60] sm:$0xff]  ;;  %v1323_v14 = vpack.c.bf16 %v608_v9, %v604_v8  ;;  %v603_v15 = vld [vmem:[%s1678_s30 + $0x50] sm:$0xff]  ;;  %v415_v17 = vld [vmem:[%s1847_s0 + $0x8] sm:$0xff] }
  0x44   : > { %1320 = vmatprep.subr.bf16.mxu1 %v1319_v2  ;;  %v607_v16 = vld [vmem:[%s1678_s30 + $0x70] sm:$0xff]  ;;  %v1317_v18 = vpack.c.bf16 %v605_v13, %v601_v12  ;;  %v846_v21 = vld [vmem:[%s1674_s28 + $0x88] sm:$0xff]  ;;  %v847_v32 = vld [vmem:[%s1674_s28 + $0x90] sm:$0xff] }
  0x45   : > { %1196 = vmatmul.mubr.msk.f32.vlgmr.msra.gmra.mrb[0].mxu0 %vm432_vm1, %v414_v58  ;;  %v1325_v19 = vpack.c.bf16 %v607_v16, %v603_v15  ;;  %v845_v20 = vld [vmem:[%s1674_s28 + $0x80] sm:$0xff]  ;;  %v878_v24 = vld [vmem:[%s1674_s28 + $0x188] sm:$0xff]  ;;  %v848_v33 = vld [vmem:[%s1674_s28 + $0x98] sm:$0xff] }
  0x46   : > { %1198 = vmatmul.mubr.msk.f32.vlgmr.msra.gmra.mrb[0].mxu1 %vm432_vm1, %v414_v58  ;;  %509 = vmatprep.mubr.f32.mxu0 %v1545_v40  ;;  %v877_v22 = vld [vmem:[%s1674_s28 + $0x180] sm:$0xff]  ;;  %v1327_v23 = vpack.c.bf16 %v846_v21, %v845_v20  ;;  %v830_v26 = vld [vmem:[%s1674_s28 + $0x8] sm:$0xff]  ;;  %v879_v34 = vld [vmem:[%s1674_s28 + $0x190] sm:$0xff]  ;;  %v1331_v35 = vpack.c.bf16 %v848_v33, %v847_v32 }
  0x47   : > { %586 = vmatprep.mubr.f32.mxu1 %v1545_v40  ;;  %1314 = vmatpush1.bf16.msra.mxu0 %v1313_v6  ;;  %v829_v25 = vld [vmem:[%s1674_s28] sm:$0xff]  ;;  %v1359_v27 = vpack.c.bf16 %v878_v24, %v877_v22  ;;  %v862_v30 = vld [vmem:[%s1674_s28 + $0x108] sm:$0xff]  ;;  %v880_v36 = vld [vmem:[%s1674_s28 + $0x198] sm:$0xff] }
  0x48   : > { %1322 = vmatpush1.bf16.msra.mxu1 %v1321_v10  ;;  %1316 = vmatprep.subr.bf16.mxu0 %v1315_v11  ;;  %v1329_v28 = vpack.c.bf16 %v830_v26, %v829_v25  ;;  %v861_v29 = vld [vmem:[%s1674_s28 + $0x100] sm:$0xff]  ;;  %v831_v37 = vld [vmem:[%s1674_s28 + $0x10] sm:$0xff]  ;;  %v832_v38 = vld [vmem:[%s1674_s28 + $0x18] sm:$0xff]  ;;  %v1363_v39 = vpack.c.bf16 %v880_v36, %v879_v34 }
  0x49   : > { %1197 = vmatmul.mubr.msk.f32.gmra.mrb[2].mxu0 %vm432_vm1, %v415_v17  ;;  %1324 = vmatprep.subr.bf16.mxu1 %v1323_v14  ;;  %v1361_v31 = vpack.c.bf16 %v862_v30, %v861_v29  ;;  %v863_v41 = vld [vmem:[%s1674_s28 + $0x110] sm:$0xff]  ;;  %v864_v42 = vld [vmem:[%s1674_s28 + $0x118] sm:$0xff]  ;;  %v849_v44 = vld [vmem:[%s1674_s28 + $0xa0] sm:$0xff] }
  0x4a   : > { %1199 = vmatmul.mubr.msk.f32.gmra.mrb[2].mxu1 %vm432_vm1, %v415_v17  ;;  %673 = vmatprep.mubr.f32.mxu0 %v1545_v40  ;;  %v1365_v43 = vpack.c.bf16 %v864_v42, %v863_v41  ;;  %v850_v45 = vld [vmem:[%s1674_s28 + $0xa8] sm:$0xff]  ;;  %v881_v46 = vld [vmem:[%s1674_s28 + $0x1a0] sm:$0xff]  ;;  %v851_v56 = vld [vmem:[%s1674_s28 + $0xb0] sm:$0xff] }
  0x4b   : > { %1318 = vmatpush1.bf16.msra.mxu0 %v1317_v18  ;;  %750 = vmatprep.mubr.f32.mxu1 %v1545_v40  ;;  %v1335_v47 = vpack.c.bf16 %v850_v45, %v849_v44  ;;  %v882_v48 = vld [vmem:[%s1674_s28 + $0x1a8] sm:$0xff]  ;;  %v833_v49 = vld [vmem:[%s1674_s28 + $0x20] sm:$0xff]  ;;  %v852_v57 = vld [vmem:[%s1674_s28 + $0xb8] sm:$0xff] }
  0x4c   : > { %1326 = vmatpush1.bf16.msra.mxu1 %v1325_v19  ;;  %1328 = vmatprep.subr.bf16.mxu0 %v1327_v23  ;;  %v834_v50 = vld [vmem:[%s1674_s28 + $0x28] sm:$0xff]  ;;  %v1367_v51 = vpack.c.bf16 %v882_v48, %v881_v46  ;;  %v865_v53 = vld [vmem:[%s1674_s28 + $0x120] sm:$0xff]  ;;  %v1339_v59 = vpack.c.bf16 %v852_v57, %v851_v56  ;;  %v884_v60 = vld [vmem:[%s1674_s28 + $0x1b8] sm:$0xff] }
  0x4d   : > { %1360 = vmatprep.subr.bf16.mxu1 %v1359_v27  ;;  %v1337_v52 = vpack.c.bf16 %v834_v50, %v833_v49  ;;  %v866_v54 = vld [vmem:[%s1674_s28 + $0x128] sm:$0xff]  ;;  %v835_v61 = vld [vmem:[%s1674_s28 + $0x30] sm:$0xff]  ;;  %v836_v62 = vld [vmem:[%s1674_s28 + $0x38] sm:$0xff] }
  0x4e   : > { %1200 = vmatmul.mubr.msk.f32.vlgmr.msra.gmra.mrb[4].mxu0 %vm432_vm1, %v414_v58  ;;  %v1369_v55 = vpack.c.bf16 %v866_v54, %v865_v53  ;;  %v1341_v0 = vpack.c.bf16 %v836_v62, %v835_v61  ;;  %v867_v1 = vld [vmem:[%s1674_s28 + $0x130] sm:$0xff]  ;;  %v868_v2 = vld [vmem:[%s1674_s28 + $0x138] sm:$0xff]  ;;  %v853_v4 = vld [vmem:[%s1674_s28 + $0xc0] sm:$0xff] }
  0x4f   : > { %1202 = vmatmul.mubr.msk.f32.vlgmr.msra.gmra.mrb[4].mxu1 %vm432_vm1, %v414_v58  ;;  %679 = vmatprep.mubr.f32.mxu0 %v1545_v40  ;;  %v883_v58 = vld [vmem:[%s1674_s28 + $0x1b0] sm:$0xff]  ;;  %v1373_v3 = vpack.c.bf16 %v868_v2, %v867_v1  ;;  %v854_v5 = vld [vmem:[%s1674_s28 + $0xc8] sm:$0xff]  ;;  %v885_v6 = vld [vmem:[%s1674_s28 + $0x1c0] sm:$0xff] }
  0x50   : > { %756 = vmatprep.mubr.f32.mxu1 %v1545_v40  ;;  %1330 = vmatpush3.bf16.msra.mxu0 %v1329_v28  ;;  %v1333_v40 = vpack.c.bf16 %v832_v38, %v831_v37  ;;  %v1371_v63 = vpack.c.bf16 %v884_v60, %v883_v58  ;;  %v1343_v7 = vpack.c.bf16 %v854_v5, %v853_v4  ;;  %v886_v8 = vld [vmem:[%s1674_s28 + $0x1c8] sm:$0xff]  ;;  %v837_v9 = vld [vmem:[%s1674_s28 + $0x40] sm:$0xff]  ;;  %v855_v16 = vld [vmem:[%s1674_s28 + $0xd0] sm:$0xff] }
  0x51   : > { %1362 = vmatpush3.bf16.msra.mxu1 %v1361_v31  ;;  %1332 = vmatprep.subr.bf16.mxu0 %v1331_v35  ;;  %v838_v10 = vld [vmem:[%s1674_s28 + $0x48] sm:$0xff]  ;;  %v1375_v11 = vpack.c.bf16 %v886_v8, %v885_v6  ;;  %v869_v13 = vld [vmem:[%s1674_s28 + $0x140] sm:$0xff]  ;;  %v887_v18 = vld [vmem:[%s1674_s28 + $0x1d0] sm:$0xff] }
  0x52   : > { %1201 = vmatmul.mubr.msk.f32.gmra.mrb[6].mxu0 %vm432_vm1, %v415_v17  ;;  %1364 = vmatprep.subr.bf16.mxu1 %v1363_v39  ;;  %v1345_v12 = vpack.c.bf16 %v838_v10, %v837_v9  ;;  %v870_v14 = vld [vmem:[%s1674_s28 + $0x148] sm:$0xff]  ;;  %v888_v20 = vld [vmem:[%s1674_s28 + $0x1d8] sm:$0xff]  ;;  %v839_v21 = vld [vmem:[%s1674_s28 + $0x50] sm:$0xff] }
  0x53   : > { %1203 = vmatmul.mubr.msk.f32.gmra.mrb[6].mxu1 %vm432_vm1, %v415_v17  ;;  %v1377_v15 = vpack.c.bf16 %v870_v14, %v869_v13  ;;  %v856_v17 = vld [vmem:[%s1674_s28 + $0xd8] sm:$0xff]  ;;  %v1379_v23 = vpack.c.bf16 %v888_v20, %v887_v18  ;;  %v871_v25 = vld [vmem:[%s1674_s28 + $0x150] sm:$0xff]  ;;  %v857_v28 = vld [vmem:[%s1674_s28 + $0xe0] sm:$0xff] }
  0x54   : > { %1334 = vmatpush3.bf16.msra.mxu0 %v1333_v40  ;;  %v1347_v19 = vpack.c.bf16 %v856_v17, %v855_v16  ;;  %v840_v22 = vld [vmem:[%s1674_s28 + $0x58] sm:$0xff]  ;;  %v858_v29 = vld [vmem:[%s1674_s28 + $0xe8] sm:$0xff]  ;;  %v889_v30 = vld [vmem:[%s1674_s28 + $0x1e0] sm:$0xff] }
  0x55   : > { %1366 = vmatpush3.bf16.msra.mxu1 %v1365_v43  ;;  %1336 = vmatprep.subr.bf16.mxu0 %v1335_v47  ;;  %v1349_v24 = vpack.c.bf16 %v840_v22, %v839_v21  ;;  %v872_v26 = vld [vmem:[%s1674_s28 + $0x158] sm:$0xff]  ;;  %v1351_v31 = vpack.c.bf16 %v858_v29, %v857_v28  ;;  %v890_v32 = vld [vmem:[%s1674_s28 + $0x1e8] sm:$0xff]  ;;  %v841_v33 = vld [vmem:[%s1674_s28 + $0x60] sm:$0xff] }
  0x56   : > { %1368 = vmatprep.subr.bf16.mxu1 %v1367_v51  ;;  %v1381_v27 = vpack.c.bf16 %v872_v26, %v871_v25  ;;  %v842_v34 = vld [vmem:[%s1674_s28 + $0x68] sm:$0xff]  ;;  %v1383_v35 = vpack.c.bf16 %v890_v32, %v889_v30  ;;  %v873_v37 = vld [vmem:[%s1674_s28 + $0x160] sm:$0xff]  ;;  %v859_v40 = vld [vmem:[%s1674_s28 + $0xf0] sm:$0xff] }
  0x57   : > { %v1353_v36 = vpack.c.bf16 %v842_v34, %v841_v33  ;;  %v874_v38 = vld [vmem:[%s1674_s28 + $0x168] sm:$0xff]  ;;  %v860_v41 = vld [vmem:[%s1674_s28 + $0xf8] sm:$0xff]  ;;  %v891_v42 = vld [vmem:[%s1674_s28 + $0x1f0] sm:$0xff] }
  0x58   : > { %1338 = vmatpush3.bf16.msra.mxu0 %v1337_v52  ;;  %v1385_v39 = vpack.c.bf16 %v874_v38, %v873_v37  ;;  %v1355_v43 = vpack.c.bf16 %v860_v41, %v859_v40  ;;  %v892_v44 = vld [vmem:[%s1674_s28 + $0x1f8] sm:$0xff]  ;;  %v843_v45 = vld [vmem:[%s1674_s28 + $0x70] sm:$0xff] }
  0x59   : > { %1370 = vmatpush3.bf16.msra.mxu1 %v1369_v55  ;;  %1340 = vmatprep.subr.bf16.mxu0 %v1339_v59  ;;  %v844_v46 = vld [vmem:[%s1674_s28 + $0x78] sm:$0xff]  ;;  %v1387_v47 = vpack.c.bf16 %v892_v44, %v891_v42  ;;  %v875_v49 = vld [vmem:[%s1674_s28 + $0x170] sm:$0xff] }
  0x5a   : > { %1372 = vmatprep.subr.bf16.mxu1 %v1371_v63  ;;  %v1357_v48 = vpack.c.bf16 %v844_v46, %v843_v45  ;;  %v876_v50 = vld [vmem:[%s1674_s28 + $0x178] sm:$0xff] }
  0x5b   : > { %v1389_v51 = vpack.c.bf16 %v876_v50, %v875_v49 }
  0x5c   : > { %1342 = vmatpush3.bf16.msra.mxu0 %v1341_v0 }
  0x5d   : > { %1374 = vmatpush3.bf16.msra.mxu1 %v1373_v3  ;;  %1344 = vmatprep.subr.bf16.mxu0 %v1343_v7 }
  0x5e   : > { %1376 = vmatprep.subr.bf16.mxu1 %v1375_v11 }
  0x60   : > { %1346 = vmatpush3.bf16.msra.mxu0 %v1345_v12 }
  0x61   : > { %1378 = vmatpush3.bf16.msra.mxu1 %v1377_v15  ;;  %1348 = vmatprep.subr.bf16.mxu0 %v1347_v19 }
  0x62   : > { %1380 = vmatprep.subr.bf16.mxu1 %v1379_v23 }
  0x64   : > { %1350 = vmatpush3.bf16.msra.mxu0 %v1349_v24 }
  0x65   : > { %1382 = vmatpush3.bf16.msra.mxu1 %v1381_v27  ;;  %1352 = vmatprep.subr.bf16.mxu0 %v1351_v31 }
  0x66   : > { %1384 = vmatprep.subr.bf16.mxu1 %v1383_v35 }
  0x68   : > { %1354 = vmatpush3.bf16.msra.mxu0 %v1353_v36 }
  0x69   : > { %1386 = vmatpush3.bf16.msra.mxu1 %v1385_v39  ;;  %1356 = vmatprep.subr.bf16.mxu0 %v1355_v43 }
  0x6a   : > { %1388 = vmatprep.subr.bf16.mxu1 %v1387_v47 }
  0x6c   : > { %1358 = vmatpush3.bf16.msra.mxu0 %v1357_v48 }
  0x6d   : > { %1390 = vmatpush3.bf16.msra.mxu1 %v1389_v51 }
 0x118   : > { %v505_v52 = vpop.f32.mrb[0].mxu0 }
 0x119   : > { %v1204_v53 = vmul.f32 -1.442695, %v505_v52  ;;  %v582_v54 = vpop.f32.mrb[0].mxu1  ;;  %v507_v55 = vpop.f32.mrb[1].mxu0 }
 0x11a   : > { %v1206_v56 = vmul.f32 -1.442695, %v582_v54  ;;  %v1205_v57 = vmul.f32 -1.442695, %v507_v55  ;;  %v584_v58 = vpop.f32.mrb[1].mxu1 }
 0x11b   : > { %1442 = vpow2.f32 %v1204_v53  ;;  %v1207_v59 = vmul.f32 -1.442695, %v584_v58 }
 0x11c   : > { %1444 = vpow2.f32 %v1206_v56  ;;  %v511_v60 = vpop.f32.mrb[2].mxu0 }
 0x11d   : > { %1446 = vpow2.f32 %v1205_v57  ;;  %v1208_v61 = vmul.f32 -1.442695, %v511_v60  ;;  %v588_v62 = vpop.f32.mrb[2].mxu1  ;;  %v513_v63 = vpop.f32.mrb[3].mxu0 }
 0x11e   : > { %1448 = vpow2.f32 %v1207_v59  ;;  %v1210_v0 = vmul.f32 -1.442695, %v588_v62  ;;  %v1209_v1 = vmul.f32 -1.442695, %v513_v63  ;;  %v590_v2 = vpop.f32.mrb[3].mxu1 }
 0x11f   : > { %1450 = vpow2.f32 %v1208_v61  ;;  %v1211_v3 = vmul.f32 -1.442695, %v590_v2 }
 0x120   : > { %1452 = vpow2.f32 %v1210_v0 }
 0x121   : > { %1454 = vpow2.f32 %v1209_v1  ;;  %v675_v4 = vpop.f32.mrb[4].mxu0 }
 0x122   : > { %1456 = vpow2.f32 %v1211_v3  ;;  %v752_v5 = vpop.f32.mrb[4].mxu1  ;;  %v677_v6 = vpop.f32.mrb[5].mxu0  ;;  %v828_v3 = vld [vmem:[#allocation2 + $0x8] sm:$0xff] }
 0x123   : > { %v754_v7 = vpop.f32.mrb[5].mxu1 }
 0x125   : > { %v1443_v8 = vpop.eup %1442  ;;  %v681_v9 = vpop.f32.mrb[6].mxu0 }
 0x126   : > { %v1445_v10 = vpop.eup %1444  ;;  %v787_v11 = vadd.f32 1.0, %v1443_v8  ;;  %v758_v12 = vpop.f32.mrb[6].mxu1 }
 0x127   : > { %v683_v13 = vpop.f32.mrb[7].mxu0  ;;  %v1447_v14 = vpop.eup %1446  ;;  %v789_v15 = vadd.f32 1.0, %v1445_v10 }
 0x128   : > { %v760_v16 = vpop.f32.mrb[7].mxu1  ;;  %v1449_v17 = vpop.eup %1448  ;;  %1458 = vrcp.f32 %v787_v11  ;;  %v788_v18 = vadd.f32 1.0, %v1447_v14 }
 0x129   : > { %v1451_v19 = vpop.eup %1450  ;;  %1460 = vrcp.f32 %v789_v15  ;;  %v790_v20 = vadd.f32 1.0, %v1449_v17 }
 0x12a   : > { %v1453_v21 = vpop.eup %1452  ;;  %1462 = vrcp.f32 %v788_v18  ;;  %v791_v22 = vadd.f32 1.0, %v1451_v19 }
 0x12b   : > { %v1455_v23 = vpop.eup %1454  ;;  %1464 = vrcp.f32 %v790_v20  ;;  %v793_v24 = vadd.f32 1.0, %v1453_v21 }
 0x12c   : > { %v1457_v25 = vpop.eup %1456  ;;  %1466 = vrcp.f32 %v791_v22  ;;  %v792_v26 = vadd.f32 1.0, %v1455_v23 }
 0x12d   : > { %1468 = vrcp.f32 %v793_v24  ;;  %v794_v27 = vadd.f32 1.0, %v1457_v25 }
 0x12e   : > { %1470 = vrcp.f32 %v792_v26 }
 0x12f   : > { %1472 = vrcp.f32 %v794_v27 }
 0x132   : > { %v1459_v28 = vpop.eup %1458 }
 0x133   : > { %v1461_v29 = vpop.eup %1460  ;;  %v811_v30 = vmul.f32 %v1459_v28, %v505_v52 }
 0x134   : > { %v1463_v31 = vpop.eup %1462  ;;  %v813_v32 = vmul.f32 %v1461_v29, %v582_v54 }
 0x135   : > { %v1465_v33 = vpop.eup %1464  ;;  %v812_v34 = vmul.f32 %v1463_v31, %v507_v55  ;;  %v819_v35 = vmul.f32 %v811_v30, %v675_v4 }
 0x136   : > { %v1467_v36 = vpop.eup %1466  ;;  %v814_v37 = vmul.f32 %v1465_v33, %v584_v58  ;;  %v821_v38 = vmul.f32 %v813_v32, %v752_v5  ;;  %v827_v58 = vld [vmem:[#allocation2] sm:$0xff] }
 0x137   : > { %v1469_v39 = vpop.eup %1468  ;;  %v815_v40 = vmul.f32 %v1467_v36, %v511_v60  ;;  %v820_v41 = vmul.f32 %v812_v34, %v677_v6 }
 0x138   : > { %v1471_v42 = vpop.eup %1470  ;;  %v817_v43 = vmul.f32 %v1469_v39, %v588_v62  ;;  %v822_v44 = vmul.f32 %v814_v37, %v754_v7 }
 0x139   : > { %v1473_v45 = vpop.eup %1472  ;;  %v816_v46 = vmul.f32 %v1471_v42, %v513_v63  ;;  %v823_v47 = vmul.f32 %v815_v40, %v681_v9  ;;  %957 = vmatprep.mubr.f32.mxu0 %v820_v41 }
 0x13a   : > { %v818_v48 = vmul.f32 %v1473_v45, %v590_v2  ;;  %v825_v49 = vmul.f32 %v817_v43, %v758_v12  ;;  %1032 = vmatprep.mubr.f32.mxu1 %v822_v44  ;;  %958 = vmatmul.mubr.f32.vlgmr.msra.gmra.mrb[8].mxu0 %v819_v35 }
 0x13b   : > { %v824_v50 = vmul.f32 %v816_v46, %v683_v13  ;;  %1033 = vmatmul.mubr.f32.vlgmr.msra.gmra.mrb[8].mxu1 %v821_v38 }
 0x13c   : > { %v826_v51 = vmul.f32 %v818_v48, %v760_v16 }
 0x13d   : > { %962 = vmatprep.mubr.f32.mxu0 %v824_v50 }
 0x13e   : > { %1037 = vmatprep.mubr.f32.mxu1 %v826_v51  ;;  %963 = vmatmul.mubr.f32.gmra.mrb[10].mxu0 %v823_v47 }
 0x13f   : > { %1038 = vmatmul.mubr.f32.gmra.mrb[10].mxu1 %v825_v49 }
 0x20d   : > { %v1251_v52 = vpop.f32.mrb[8].mxu0 }
 0x20e   : > { %v1289_v53 = vpop.f32.mrb[8].mxu1  ;;  %v1252_v54 = vpop.f32.mrb[9].mxu0 }
 0x20f   : > { %v1253_v55 = vadd.f32 %v1252_v54, %v1251_v52  ;;  %v1290_v56 = vpop.f32.mrb[9].mxu1 }
 0x210   : > { %v1291_v57 = vadd.f32 %v1290_v56, %v1289_v53 }
 0x211   : > { %v1254_v59 = vpop.f32.mrb[10].mxu0 }
 0x212   : > { %v1035_v60 = vadd.f32 %v1291_v57, %v1253_v55  ;;  %v1292_v61 = vpop.f32.mrb[10].mxu1  ;;  %v1255_v62 = vpop.f32.mrb[11].mxu0 }
 0x213   : > { %v1256_v63 = vadd.f32 %v1255_v62, %v1254_v59  ;;  %v1293_v0 = vpop.f32.mrb[11].mxu1 }
 0x214   : > { %v1043_v1 = vadd.f32 %v1035_v60, %v827_v58  ;;  %v1294_v2 = vadd.f32 %v1293_v0, %v1292_v61  ;;  %1050 = sbr.rel (%p1212_p11) target bundleno = 547 (0x223), region = 90 }
 0x216   : > { %1045 = vst.msk [vmem:[#allocation2] sm:$0xff] %vm432_vm1, %v1043_v1  ;;  %v1040_v4 = vadd.f32 %v1294_v2, %v1256_v63 }
 0x218   : > { %v1044_v5 = vadd.f32 %v1040_v4, %v828_v3 }
 0x21a   : > { %1046 = vst.msk [vmem:[#allocation2 + $0x8] sm:$0xff] %vm432_vm1, %v1044_v5 }
 0x21d   : > { %v1051_v6 = vld [vmem:[#allocation2] sm:$0xff] }
 0x21e   : > { %1053 = vst.msk [vmem:[#allocation5] sm:$0xff] %vm432_vm1, %v1051_v6 }
 0x221   : > { %v1052_v7 = vld [vmem:[#allocation2 + $0x8] sm:$0xff] }
 0x222   : > { %1054 = vst.msk [vmem:[#allocation5 + $0x8] sm:$0xff] %vm432_vm1, %v1052_v7 }
 0x223 PF: > { %p1806_p12 = scmp.eq.s32.totalorder %s1180_s20, 1  ;;  %s1546_s9 = smov [#allocation5]  }
 0x224   : > { %s1066_s10 = sshll.u32 %s1546_s9, 4  ;;  %s1067_s10 = int_to_ptr.vmem [resolvable:$true] %s1066_s10 }
 0x225   : > { %s1474_s11 = scalar_lea.vmem %s1067_s10, 256  ;;  %p1481_p2 = scmp.lt.s32.totalorder %s1067_s10, %s1067_s10 }
 0x226   : > { %p1475_p13 = scmp.ne.s32.totalorder %s1067_s10, %s1474_s11  ;;  %p1482_p3 = scmp.lt.s32.totalorder %s1474_s11, %s1474_s11 }
 0x228   : > { %p1476_p0 = pnand %p1475_p13, %p1806_p12  ;;  %p1483_p4 = por %p1482_p3, %p1481_p2 }
 0x22a   : > { %p1477_p1 = pneg %p1476_p0 }
 0x22c   : > { %p1484_p5 = pnand %p1483_p4, %p1477_p1 }
 0x22e   : > { %1487 = shalt.err (!%p1484_p5)
}
 0x22f   : > { %s1488_s20 = scalar_lea.hbm %s1851_s4, 256 }
 0x230   : > { %p1489_p6 = scmp.ne.s32.totalorder %s1851_s4, %s1488_s20  ;;  %p1494_p9 = scmp.lt.u32.totalorder %s1488_s20, %s1851_s4 }
 0x232   : > { %p1490_p7 = pnand %p1489_p6, %p1806_p12 }
 0x234   : > { %p1491_p8 = pneg %p1490_p7 }
 0x236   : > { %p1496_p10 = pnand %p1494_p9, %p1491_p8 }
 0x238   : > { %1499 = shalt.err (!%p1496_p10)
}
 0x239   : > { %s1547_s24 = smov 128   ;;  %s1548_s26 = smov 8  }
 0x23a   : > { %1392 = dma.vmem_to_hbm [thread:$0]  (%p1806_p12), %s1067_s10, 256, %s1851_s4, [#allocation6], %s1547_s24, %s1547_s24, %s1548_s26  }
 0x23b   : > { %1521 = dma.done.wait (%p1806_p12), [#allocation6], 256  }
 0x23c   : > { %1523 = vsyncadd (%p1806_p12), [#allocation6], 4294967040 }
 0x23d PF: > { %s15_s19 = sadd.s32 1, %s1542_s19   ;;  %s1854_s15 = smov %s1530_s16 }
 0x23e   : > { %p12_p11 = scmp.ge.s32.totalorder %s15_s19, 4   ;;  %s1855_s16 = smov %s1614_s25 }
 0x23f   : > { %s1856_s17 = smov %s1538_s18  ;;  %s1857_s18 = smov %s1859_s21 }
 0x240   :  { %14 = sbr.rel (!%p12_p11) target bundleno = 3 (0x3), region = 137 }
 0x247   :  { %1082 = vsyncpa [#allocation6], 1 }
 0x248   :  { %1084 = vsyncpa [#allocation6 + $0x1], 1 }

</bundles_post_ra>
